<compile_context>
chip_gen: v5e
topology: v5e:2x2
jax: 0.10.0
libtpu: 0.0.40
codegen_flags: <defaults>
</compile_context>

<pallas_src>
import jax
import jax.numpy as jnp
from jax.experimental import pallas as pl
from jax.experimental.pallas import tpu as pltpu


def _make_se_kernel(inv_hw):
    """inv_hw = 1 / (H*W); closed over as a compile-time constant."""

    def se_kernel(x_ref, w1t_ref, b1_ref, w2t_ref, b2_ref, o_ref):
        # x block: (TB, C, HW); w1t: (C, Cr), b1: (1, Cr), w2t: (Cr, C), b2: (1, C)

        # AdaptiveAvgPool2d(1): spatial mean with f32 accumulation.  Read the
        # tile straight from the ref (do NOT keep the slab live across the
        # matmuls — it cannot fit in 64 vregs and would spill to VMEM).
        m = jnp.sum(x_ref[...], axis=-1, dtype=jnp.float32) * inv_hw    # (TB, C)

        # fc1 (1x1 conv) + ReLU — one matmul for the whole batch tile.
        z1 = jnp.dot(m, w1t_ref[...],
                     preferred_element_type=jnp.float32) + b1_ref[...]
        h = jnp.maximum(z1, 0.0)                                        # (TB, Cr)

        # fc2 (1x1 conv) + sigmoid.
        z2 = jnp.dot(h, w2t_ref[...],
                     preferred_element_type=jnp.float32) + b2_ref[...]
        s = jax.nn.sigmoid(z2).astype(o_ref.dtype)                      # (TB, C)

        # Rescale in the input dtype: re-read x_ref (second streaming pass).
        o_ref[...] = x_ref[...] * s[:, :, None]

    return se_kernel


def _tpu_vmem_bytes():
    try:
        return int(pltpu.get_tpu_info().vmem_capacity_bytes)
    except Exception:
        return 64 << 20          # conservative fallback if the query fails


def _choose_batch_tile(B, bytes_per_batch, *, vmem_budget, dma_target,
                       prefer_even_grid=False):
    """Pick a batch tile TB such that:
      * the pipelined working set (~4x block: double-buffered in + out) stays
        inside vmem_budget,
      * TB stops growing once a block reaches the DMA-size target,
      * the grid keeps >= 2 steps when B >= 2 (lets the 'parallel' batch axis
        shard across both v7x TensorCores),
      * optionally (v7x) the grid length is even for megacore load balance.
    Non-dividing B is fine: the caller uses pl.cdiv(B, tb) and Pallas masks
    the partial last block."""
    max_tb = max(1, int(vmem_budget // (4 * max(bytes_per_batch, 1))))
    max_tb = min(max_tb, B)

    tb = 1
    while tb < max_tb and tb * bytes_per_batch < dma_target:
        tb += 1

    if B >= 2:
        tb = min(tb, pl.cdiv(B, 2))          # keep the grid >= 2 steps

    if prefer_even_grid and B >= 2:
        # Shrink by at most 3 to find an even grid length (2-TC balance).
        for cand in range(tb, max(1, tb - 3) - 1, -1):
            if pl.cdiv(B, cand) % 2 == 0:
                tb = cand
                break
    return tb


def se_module(x, w1, b1, w2, b2):
    """x: (B, C, H, W) NCHW; w1: (Cr, C), b1: (Cr,), w2: (C, Cr), b2: (C,)."""
    B, C, H, W = x.shape
    Cr = w1.shape[0]
    HW = H * W

    # Unpadded flatten of the spatial dims (free reshape, no extra HBM pass).
    x3 = x.reshape(B, C, HW)

    itemsize = jnp.dtype(x.dtype).itemsize
    bytes_per_batch = C * HW * itemsize

    # Generation-aware VMEM budgeting.
    vmem_cap = _tpu_vmem_bytes()
    small_vmem = vmem_cap <= (64 << 20)      # v7x-like: 64 MiB/TC, 2 TCs/chip
    if small_vmem:
        vmem_budget, dma_target, limit_cap = 28 << 20, 2 << 20, 48 << 20
    else:                                    # v5e / v6e: 128 MiB/TC
        vmem_budget, dma_target, limit_cap = 96 << 20, 6 << 20, 112 << 20

    tb = _choose_batch_tile(B, bytes_per_batch,
                            vmem_budget=vmem_budget,
                            dma_target=dma_target,
                            prefer_even_grid=small_vmem)
    grid = (pl.cdiv(B, tb),)

    # VMEM limit: double-buffered input + output blocks + (small) weights,
    # with 25% headroom; >= 32 MiB floor lifts v5e's 16 MiB scoped default,
    # capped below the chip's physical per-TC VMEM.
    block_bytes = tb * bytes_per_batch
    weight_bytes = 4 * (2 * C * Cr + C + Cr)
    vmem_limit = int(min(limit_cap,
                         max(32 << 20,
                             (4 * block_bytes + 2 * weight_bytes) * 5 // 4)))

    # Pre-transpose / pre-cast the 1x1-conv weights so the kernel needs no
    # transposes or casts; biases become row vectors for sublane broadcast.
    w1t = w1.astype(jnp.float32).T            # (C, Cr)
    w2t = w2.astype(jnp.float32).T            # (Cr, C)
    b1r = b1.astype(jnp.float32).reshape(1, Cr)
    b2r = b2.astype(jnp.float32).reshape(1, C)

    out3 = pl.pallas_call(
        _make_se_kernel(1.0 / float(HW)),
        out_shape=jax.ShapeDtypeStruct((B, C, HW), x.dtype),
        grid_spec=pltpu.PrefetchScalarGridSpec(
            num_scalar_prefetch=0,
            grid=grid,
            in_specs=[
                pl.BlockSpec((tb, C, HW), lambda b: (b, 0, 0)),  # x (batch-tiled)
                pl.BlockSpec((C, Cr), lambda b: (0, 0)),         # w1^T
                pl.BlockSpec((1, Cr), lambda b: (0, 0)),         # b1
                pl.BlockSpec((Cr, C), lambda b: (0, 0)),         # w2^T
                pl.BlockSpec((1, C), lambda b: (0, 0)),          # b2
            ],
            out_specs=pl.BlockSpec((tb, C, HW), lambda b: (b, 0, 0)),
        ),
        compiler_params=pltpu.CompilerParams(
            dimension_semantics=("parallel",),
            vmem_limit_bytes=vmem_limit),
    )(x3, w1t, b1r, w2t, b2r)

    return out3.reshape(B, C, H, W)


def se_ref(x, w1, b1, w2, b2):
    """Pure-JAX f32 reference matching the PyTorch forward exactly."""
    xf = x.astype(jnp.float32)
    m = jnp.mean(xf, axis=(2, 3))                                      # (B, C)
    h = jnp.maximum(m @ w1.astype(jnp.float32).T + b1.astype(jnp.float32), 0.0)
    s = jax.nn.sigmoid(h @ w2.astype(jnp.float32).T + b2.astype(jnp.float32))
    return xf * s[:, :, None, None]


if __name__ == "__main__":
    key = jax.random.PRNGKey(0)
    kx, kw1, kb1, kw2, kb2 = jax.random.split(key, 5)

    def run_case(B, C, H, W, reduction, dtype, atol, rtol):
        Cr = max(1, C // reduction)
        x = jax.random.normal(kx, (B, C, H, W), dtype=jnp.float32).astype(dtype)
        # Conv2d(C, Cr, 1) -> weight (Cr, C, 1, 1) squeezed to (Cr, C), bias (Cr,)
        w1 = jax.random.normal(kw1, (Cr, C), dtype=jnp.float32) * 0.1
        b1 = jax.random.normal(kb1, (Cr,), dtype=jnp.float32) * 0.1
        # Conv2d(Cr, C, 1) -> weight (C, Cr), bias (C,)
        w2 = jax.random.normal(kw2, (C, Cr), dtype=jnp.float32) * 0.1
        b2 = jax.random.normal(kb2, (C,), dtype=jnp.float32) * 0.1

        out = jax.block_until_ready(se_module(x, w1, b1, w2, b2))
        ref = se_ref(x, w1, b1, w2, b2)
        assert out.shape == (B, C, H, W)
        assert jnp.allclose(out.astype(jnp.float32), ref, atol=atol, rtol=rtol), \
            f"mismatch vs reference: B={B} C={C} H={H} W={W} dtype={dtype}"

    # tb=1, grid=2, f32, HW = 256.
    run_case(2, 8, 16, 16, 4, jnp.float32, 1e-5, 1e-5)
    # HW = 49 (not a multiple of 128): exercises the unpadded, lane-masked store path.
    run_case(2, 8, 7, 7, 4, jnp.float32, 1e-5, 1e-5)
    # Batch-tiled path with full blocks: tb > 1, grid = 2.
    run_case(8, 8, 16, 16, 4, jnp.float32, 1e-5, 1e-5)
    # Non-dividing B (partial last batch block) + bf16 inputs.
    run_case(5, 16, 7, 7, 4, jnp.bfloat16, 4e-2, 4e-2)

    print("KERNEL_OK")
</pallas_src>

<mosaic_0001>
module attributes {stable_mosaic.version = 11 : i64} {
  func.func @se_kernel(%arg0: i32, %arg1: memref<1x8x256xf32, #tpu.memory_space<vmem>>, %arg2: memref<8x2xf32, #tpu.memory_space<vmem>>, %arg3: memref<1x2xf32, #tpu.memory_space<vmem>>, %arg4: memref<2x8xf32, #tpu.memory_space<vmem>>, %arg5: memref<1x8xf32, #tpu.memory_space<vmem>>, %arg6: memref<1x8x256xf32, #tpu.memory_space<vmem>>) attributes {dimension_semantics = [#tpu.dimension_semantics<parallel>], iteration_bounds = array<i64: 2>, scalar_prefetch = 0 : i64, scratch_operands = 0 : i64, tpu.core_type = #tpu.core_type<tc>, window_params = [{transform_indices = @transform_0, window_bounds = array<i64: 1, 8, 256>}, {pipeline_mode = #tpu.pipeline_mode<synchronous>, transform_indices = @transform_1, window_bounds = array<i64: 8, 2>}, {pipeline_mode = #tpu.pipeline_mode<synchronous>, transform_indices = @transform_2, window_bounds = array<i64: 1, 2>}, {pipeline_mode = #tpu.pipeline_mode<synchronous>, transform_indices = @transform_3, window_bounds = array<i64: 2, 8>}, {pipeline_mode = #tpu.pipeline_mode<synchronous>, transform_indices = @transform_4, window_bounds = array<i64: 1, 8>}, {transform_indices = @transform_5, window_bounds = array<i64: 1, 8, 256>}]} {
    %c0 = arith.constant 0 : index
    %c0_0 = arith.constant 0 : index
    %c0_1 = arith.constant 0 : index
    %0 = vector.load %arg1[%c0, %c0_0, %c0_1] : memref<1x8x256xf32, #tpu.memory_space<vmem>>, vector<1x8x256xf32>
    %cst = arith.constant dense<0.000000e+00> : vector<1x8xf32>
    %1 = vector.multi_reduction <add>, %0, %cst [2] : vector<1x8x256xf32> to vector<1x8xf32>
    %cst_2 = arith.constant 3.906250e-03 : f32
    %2 = vector.broadcast %cst_2 : f32 to vector<1x8xf32>
    %3 = arith.mulf %1, %2 : vector<1x8xf32>
    %c0_3 = arith.constant 0 : index
    %c0_4 = arith.constant 0 : index
    %4 = vector.load %arg2[%c0_3, %c0_4] : memref<8x2xf32, #tpu.memory_space<vmem>>, vector<8x2xf32>
    %cst_5 = arith.constant dense<0.000000e+00> : vector<1x2xf32>
    %5 = tpu.matmul %3, %4, %cst_5 {dimension_numbers = #tpu.dot_dimension_numbers<[1], [0], [0], [1], [0, 0, 1, 1], [], []>} : vector<1x8xf32>, vector<8x2xf32>, vector<1x2xf32> -> vector<1x2xf32>
    %c0_6 = arith.constant 0 : index
    %c0_7 = arith.constant 0 : index
    %6 = vector.load %arg3[%c0_6, %c0_7] : memref<1x2xf32, #tpu.memory_space<vmem>>, vector<1x2xf32>
    %7 = arith.addf %5, %6 : vector<1x2xf32>
    %cst_8 = arith.constant 0.000000e+00 : f32
    %8 = vector.broadcast %cst_8 : f32 to vector<1x2xf32>
    %9 = arith.maximumf %7, %8 : vector<1x2xf32>
    %c0_9 = arith.constant 0 : index
    %c0_10 = arith.constant 0 : index
    %10 = vector.load %arg4[%c0_9, %c0_10] : memref<2x8xf32, #tpu.memory_space<vmem>>, vector<2x8xf32>
    %cst_11 = arith.constant dense<0.000000e+00> : vector<1x8xf32>
    %11 = tpu.matmul %9, %10, %cst_11 {dimension_numbers = #tpu.dot_dimension_numbers<[1], [0], [0], [1], [0, 0, 1, 1], [], []>} : vector<1x2xf32>, vector<2x8xf32>, vector<1x8xf32> -> vector<1x8xf32>
    %c0_12 = arith.constant 0 : index
    %c0_13 = arith.constant 0 : index
    %12 = vector.load %arg5[%c0_12, %c0_13] : memref<1x8xf32, #tpu.memory_space<vmem>>, vector<1x8xf32>
    %13 = arith.addf %11, %12 : vector<1x8xf32>
    %14 = arith.negf %13 : vector<1x8xf32>
    %15 = math.exp %14 : vector<1x8xf32>
    %cst_14 = arith.constant 1.000000e+00 : f32
    %16 = vector.broadcast %cst_14 : f32 to vector<1x8xf32>
    %17 = arith.addf %16, %15 : vector<1x8xf32>
    %18 = arith.divf %16, %17 : vector<1x8xf32>
    %c0_15 = arith.constant 0 : index
    %c0_16 = arith.constant 0 : index
    %c0_17 = arith.constant 0 : index
    %19 = vector.load %arg1[%c0_15, %c0_16, %c0_17] : memref<1x8x256xf32, #tpu.memory_space<vmem>>, vector<1x8x256xf32>
    %20 = vector.shape_cast %18 : vector<1x8xf32> to vector<1x8x1xf32>
    %21 = vector.broadcast %20 : vector<1x8x1xf32> to vector<1x8x256xf32>
    %22 = arith.mulf %19, %21 : vector<1x8x256xf32>
    %c0_18 = arith.constant 0 : index
    %c0_19 = arith.constant 0 : index
    %c0_20 = arith.constant 0 : index
    %23 = vector.load %arg6[%c0_18, %c0_19, %c0_20] : memref<1x8x256xf32, #tpu.memory_space<vmem>>, vector<1x8x256xf32>
    tpu.vector_store %arg6[%c0_18, %c0_19, %c0_20], %22 {strides = array<i32>} : memref<1x8x256xf32, #tpu.memory_space<vmem>>, vector<1x8x256xf32>,
    return
  }
  func.func @transform_0(%arg0: i32) -> (i32, i32, i32) {
    %c0_i32 = arith.constant 0 : i32
    %c0_i32_0 = arith.constant 0 : i32
    %c0_i32_1 = arith.constant 0 : i32
    return %arg0, %c0_i32, %c0_i32_0 : i32, i32, i32
  }
  func.func @transform_1(%arg0: i32) -> (i32, i32) {
    %c0_i32 = arith.constant 0 : i32
    %c0_i32_0 = arith.constant 0 : i32
    %c0_i32_1 = arith.constant 0 : i32
    return %c0_i32, %c0_i32_0 : i32, i32
  }
  func.func @transform_2(%arg0: i32) -> (i32, i32) {
    %c0_i32 = arith.constant 0 : i32
    %c0_i32_0 = arith.constant 0 : i32
    %c0_i32_1 = arith.constant 0 : i32
    return %c0_i32, %c0_i32_0 : i32, i32
  }
  func.func @transform_3(%arg0: i32) -> (i32, i32) {
    %c0_i32 = arith.constant 0 : i32
    %c0_i32_0 = arith.constant 0 : i32
    %c0_i32_1 = arith.constant 0 : i32
    return %c0_i32, %c0_i32_0 : i32, i32
  }
  func.func @transform_4(%arg0: i32) -> (i32, i32) {
    %c0_i32 = arith.constant 0 : i32
    %c0_i32_0 = arith.constant 0 : i32
    %c0_i32_1 = arith.constant 0 : i32
    return %c0_i32, %c0_i32_0 : i32, i32
  }
  func.func @transform_5(%arg0: i32) -> (i32, i32, i32) {
    %c0_i32 = arith.constant 0 : i32
    %c0_i32_0 = arith.constant 0 : i32
    %c0_i32_1 = arith.constant 0 : i32
    return %arg0, %c0_i32, %c0_i32_0 : i32, i32, i32
  }
}

</mosaic_0001>

<bundles_post_ra>
// kernel: tpu_custom_call.1
= control target key start
LH: loop header
LB: loop body
LE: loop exit
PB: predicated region body
PF: predicated region fallthrough
CT: control target
= control target key end

     0   :  { %10 = vsyncpa [#allocation3], 0  ;;  %s768_s0 = inlined_call_operand.hbm [shape: f32[2,8,256], index: 0, kind: input, shape index: {}]   ;;  %s769_s1 = inlined_call_operand.vmem [shape: f32[8,2], index: 1, kind: input, shape index: {}]   ;;  %s770_s2 = inlined_call_operand.vmem [shape: f32[1,2], index: 2, kind: input, shape index: {}]   ;;  %s771_s3 = inlined_call_operand.vmem [shape: f32[2,8], index: 3, kind: input, shape index: {}]   ;;  %s772_s4 = inlined_call_operand.vmem [shape: f32[1,8], index: 4, kind: input, shape index: {}]   ;;  %s773_s5 = inlined_call_operand.hbm [shape: f32[2,8,256], index: 5, kind: output, shape index: {}]  }
   0x1   :  { %12 = vsyncpa [#allocation3 + $0x1], 0 }
   0x2   :  { %13 = vsyncpa [#allocation4], 0 }
   0x3   :  { %15 = vsyncpa [#allocation4 + $0x1], 0  ;;  %s625_s18 = smov 0   ;;  %s627_s19 = smov 0  }
   0x4   :  { %s629_s20 = smov 0   ;;  %s631_s21 = smov 0  }
   0x5 LB: > { %s646_s22 = sadd.s32 4294967295, %s593_s21   ;;  %s426_s23 = sadd.s32 4294967294, %s593_s21   ;;  %s593_s21 = sphi %s631_s21, %s783_s21   ;;  %s589_s20 = sphi %s629_s20, %s782_s20   ;;  %s585_s19 = sphi %s627_s19, %s781_s19   ;;  %s581_s18 = sphi %s625_s18, %s780_s18  }
   0x6   : > { %s650_s24 = sadd.s32 1, %s593_s21   ;;  %s28_s25 = sadd.s32 1, %s589_s20 }
   0x7   : > { %s25_s26 = ssub.s32 %s593_s21, %s650_s24  ;;  %p35_p0 = scmp.ne.s32.totalorder %s589_s20, %s585_s19 }
   0x8   : > { %p26_p1 = scmp.eq.s32.totalorder %s25_s26, 0  ;;  %p36_p2 = scmp.eq.s32.totalorder %s593_s21, 0 }
   0x9   : > { %p41_p3 = scmp.ne.s32.totalorder %s585_s19, %s581_s18  ;;  %p42_p4 = scmp.eq.s32.totalorder %s646_s22, 0 }
   0xa   : > { %s662_s27 = scalar_select %p26_p1, %s589_s20, %s28_s25  }
   0xb   : > { %p664_p5 = por %p36_p2, %p35_p0  ;;  %p668_p6 = por %p42_p4, %p41_p3 }
   0xc   : > { %p149_p7 = scmp.eq.s32.totalorder %s646_s22, 1  ;;  %p155_p8 = scmp.eq.s32.totalorder %s426_s23, 1 }
   0xd   : > { %p458_p10 = scmp.lt.s32.totalorder %s593_s21, 2  ;;  %s187_s7 = sand.u32 1, %s589_s20  }
   0xe   : > { %p675_p11 = por %p149_p7, %p35_p0  ;;  %p679_p12 = por %p155_p8, %p41_p3 }
   0xf   : > { %s444_s8 = sshll.u32 %s593_s21, 4  ;;  %s429_s9 = sshll.u32 %s187_s7, 4 }
  0x10   : > { %s196_s12 = scalar_lea.hbm %s768_s0, %s444_s8  ;;  %s191_s14 = scalar_lea.vmem [#allocation2], %s429_s9 }
  0x11   : > { %s198_s13 = sshll.u32 %s196_s12, 4  ;;  %s200_s15 = sshll.u32 %s191_s14, 4  ;;  %s199_s13 = int_to_ptr.hbm [resolvable:$true] %s198_s13  ;;  %s201_s15 = int_to_ptr.vmem [resolvable:$true] %s200_s15 }
  0x12   : > { %p690_p13 = pnand %p458_p10, %p664_p5  ;;  %p432_p0 = scmp.ge.s32.totalorder %s593_s21, 1 }
  0x13   : > { %p205_p1 = scmp.lt.s32.totalorder %s593_s21, 3  ;;  %s188_s17 = scalar_lea.sflag [#allocation3], %s187_s7 }
  0x14   : > { %s497_s23 = sshra.s32 %s199_s13, 4  ;;  %p501_p3 = pneg %p690_p13  ;;  %s498_s23 = int_to_ptr.hbm [resolvable:$true] %s497_s23 }
  0x15   : > { %s499_s25 = scalar_lea.hbm %s498_s23, 16  ;;  %s504_s28 = scalar_lea.hbm %s768_s0, 32 }
  0x16   : > { %p500_p2 = scmp.ne.s32.totalorder %s498_s23, %s499_s25  ;;  %p505_p5 = scmp.lt.s32.totalorder %s498_s23, %s768_s0 }
  0x17   : > { %p506_p8 = scmp.lt.s32.totalorder %s504_s28, %s499_s25 }
  0x18   : > { %p502_p4 = pnand %p501_p3, %p500_p2 }
  0x19   : > { %p507_p10 = por %p506_p8, %p505_p5 }
  0x1a   : > { %p503_p7 = pneg %p502_p4 }
  0x1c   : > { %p508_p9 = pnand %p507_p10, %p503_p7 }
  0x1e   : > { %511 = shalt.err (!%p508_p9)
}
  0x1f   : > { %453 = dma.hbm_to_vmem [thread:$0]  (!%p690_p13), %s199_s13, 256, %s201_s15, %s188_s17  }
  0x20   : > { %p206_p2 = pnand %p432_p0, %p205_p1 }
  0x21   : > { %s711_s7 = sand.u32 (!%p206_p2), 1, %s585_s19  }
  0x22   : > { %209 = sbr.rel (%p206_p2) target bundleno = 572 (0x23c), region = 40  ;;  %s433_s11 = sshll.u32 (!%p206_p2), %s711_s7, 4 }
  0x23   : > { %s212_s12 = scalar_lea.sflag (!%p206_p2), [#allocation3], %s711_s7  ;;  %s215_s14 = scalar_lea.vmem (!%p206_p2), [#allocation2], %s433_s11 }
  0x27   : > { %572 = dma.done.wait (%p668_p6), %s212_s12, 256  }
  0x28   : > { %574 = vsyncadd (%p668_p6), %s212_s12, 4294967040  ;;  %v243_v0 = vld [vmem:[%s215_s14] sm:$0xff]  ;;  %v244_v1 = vld [vmem:[%s215_s14 + $0x8] sm:$0xff]  ;;  %v252_v4 = vlaneseq  ;;  %vm255_vm0 = vcmask 64512   ;;  %vm285_vm1 = vcmask 1041408   ;;  %vm281_vm2 = vcmask 15360  }
  0x29   : > { %v245_v2 = vadd.f32 %v244_v1, %v243_v0  ;;  %v249_v3 = vld [vmem:[%s769_s1] sm:$0xff]  ;;  %s445_s8 = sshll.u32 %s646_s22, 4  ;;  %s242_s12 = scalar_lea.vmem [#allocation5], %s433_s11 }
  0x2a   : > { %273 = vmatpush.msra.mxu0 %v249_v3  ;;  %v253_v5 = vand.u32 127, %v252_v4  ;;  %v279_v9 = vld [vmem:[%s771_s3] sm:$0x3]  ;;  %v330_v14 = vshrl.u32 %v252_v4, 7  ;;  %s351_s10 = scalar_lea.hbm %s773_s5, %s445_s8  ;;  %s353_s14 = sshll.u32 %s242_s12, 4  ;;  %s354_s14 = int_to_ptr.vmem [resolvable:$true] %s353_s14 }
  0x2b   : > { %246 = vadd.xlane.f32.xlu0 %v245_v2  ;;  %436 = vmatpush.msk.msra.mxu1 %vm285_vm1, %v279_v9  ;;  %v250_v10 = vld [vmem:[%s770_s2] sm:$0x1]  ;;  %s355_s13 = sshll.u32 %s351_s10, 4  ;;  %s340_s15 = scalar_lea.sflag [#allocation4], %s711_s7  ;;  %s356_s13 = int_to_ptr.hbm [resolvable:$true] %s355_s13 }
  0x2c   : > { %492 = vset.pattern.permute.xlu0 %v330_v14  ;;  %v280_v15 = vld [vmem:[%s772_s4] sm:$0x1]  ;;  %s541_s16 = sshra.s32 %s356_s13, 4  ;;  %s547_s11 = scalar_lea.hbm %s773_s5, 32  ;;  %s542_s16 = int_to_ptr.hbm [resolvable:$true] %s541_s16 }
  0x2d   : > { %s543_s22 = scalar_lea.hbm %s542_s16, 16  ;;  %p548_p0 = scmp.lt.s32.totalorder %s542_s16, %s773_s5 }
  0x2e   : > { %p544_p6 = scmp.ne.s32.totalorder %s542_s16, %s543_s22  ;;  %p549_p1 = scmp.lt.s32.totalorder %s547_s11, %s543_s22 }
  0x30   : > { %p545_p9 = pnand %p544_p6, %p675_p11  ;;  %p550_p3 = por %p549_p1, %p548_p0 }
  0x32   : > { %p546_p13 = pneg %p545_p9 }
  0x34   : > { %p551_p4 = pnand %p550_p3, %p546_p13 }
  0x9e   : > { %v247_v6 = vpop.xlane.xlu0 %246 }
  0x9f   : > { %v248_v7 = vmul.f32 0.00390625, %v247_v6 }
  0xa1   : > { %v254_v8 = vperm.slane %v248_v7, %v253_v5 }
  0xa3   : > { %435 = vmatmul.msk.f32.vlgmr.msra.gmra.mxu0 %vm255_vm0, %v254_v8 }
 0x120   : > { %v275_v11 = vpop.f32.mrf.mxu0 }
 0x121   : > { %v276_v12 = vadd.f32 %v275_v11, %v250_v10 }
 0x123   : > { %v278_v13 = vmax.f32 %v276_v12, 0.0 }
 0x125   : > { %437 = vmatmul.msk.f32.vlgmr.msra.gmra.mxu1 %vm281_vm2, %v278_v13 }
 0x1a2   : > { %v306_v16 = vpop.f32.mrf.mxu1 }
 0x1a3   : > { %v307_v17 = vadd.f32 %v306_v16, %v280_v15 }
 0x1a5   : > { %v438_v18 = vmul.f32 -1.442695, %v307_v17 }
 0x1a7   : > { %493 = vpow2.f32 %v438_v18 }
 0x1ad   : > { %v494_v19 = vpop.eup %493 }
 0x1ae   : > { %v312_v20 = vadd.f32 1.0, %v494_v19 }
 0x1b0   : > { %495 = vrcp.f32 %v312_v20  ;;  %v324_v24 = vand.u32 2147483648, %v312_v20  ;;  %v322_v26 = vand.u32 2147483647, %v312_v20  ;;  %vm318_vm4 = vweird.f32 %v312_v20 }
 0x1b2   : > { %v325_v28 = vor.u32 1.1754944e-38, %v324_v24  ;;  %vm323_vm6 = vcmp.eq.f32.partialorder %v322_v26, 8.507059e+37 }
 0x1b6   : > { %v496_v21 = vpop.eup %495 }
 0x1b7   : > { %v314_v22 = vmul.f32 %v496_v21, %v312_v20  ;;  %vm319_vm3 = vweird.f32 %v496_v21 }
 0x1b8   : > { %vm320_vm5 = vmor %vm318_vm4, %vm319_vm3 }
 0x1b9   : > { %v315_v23 = vsub.f32 1.0, %v314_v22 }
 0x1bb   : > { %v316_v25 = vmul.f32 %v496_v21, %v315_v23 }
 0x1bd   : > { %v317_v27 = vadd.f32 %v496_v21, %v316_v25 }
 0x1bf   : > { %v321_v29 = vsel %vm320_vm5, %v496_v21, %v317_v27 }
 0x1c0   : > { %v326_v30 = vsel %vm323_vm6, %v325_v28, %v321_v29 }
 0x1c1   : > { %v328_v31 = vperm.slane %v326_v30, 0 }
 0x1c3   : > { %333 = vperm.xlu0 %492, %v328_v31  }
 0x235   : > { %v334_v32 = vpop.permute.xlu0 %333 }
 0x236   : > { %v335_v33 = vmul.f32 %v334_v32, %v243_v0  ;;  %v336_v34 = vmul.f32 %v334_v32, %v244_v1 }
 0x238   : > { %337 = vst [vmem:[%s242_s12] sm:$0xff] %v335_v33 }
 0x239   : > { %338 = vst [vmem:[%s242_s12 + $0x8] sm:$0xff] %v336_v34 }
 0x23a   : > { %554 = shalt.err (!%p551_p4)
}
 0x23b   : > { %448 = dma.vmem_to_hbm [thread:$0]  (%p675_p11), %s354_s14, 256, %s356_s13, %s340_s15  }
 0x23c PF: > { %s367_s7 = sand.u32 1, %s581_s18   ;;  %p779_p7 = scmp.ge.s32.totalorder %s593_s21, 2 }
 0x23d   : > { %s368_s26 = scalar_lea.sflag [#allocation4], %s367_s7 }
 0x23e   : > { %p455_p5 = pnand %p779_p7, %p679_p12 }
 0x240   : > { %p456_p8 = pneg %p455_p5 }
 0x242   : > { %576 = dma.done.wait (%p456_p8), %s368_s26, 256  }
 0x243   : > { %578 = vsyncadd (%p456_p8), %s368_s26, 4294967040  ;;  %p18_p10 = scmp.ge.s32.totalorder %s650_s24, 4   ;;  %s780_s18 = smov %s585_s19 }
 0x244   : > { %s781_s19 = smov %s589_s20  ;;  %s782_s20 = smov %s662_s27 }
 0x245   : > { %s783_s21 = smov %s650_s24  ;;  %20 = sbr.rel (!%p18_p10) target bundleno = 5 (0x5), region = 85 }
 0x24a   :  { %374 = vsyncpa [#allocation3], 1 }
 0x24b   :  { %376 = vsyncpa [#allocation3 + $0x1], 1 }
 0x24c   :  { %377 = vsyncpa [#allocation4], 1 }
 0x24d   :  { %379 = vsyncpa [#allocation4 + $0x1], 1 }

</bundles_post_ra>
